<compile_context>
chip_gen: v6e
topology: v6e:2x2x1
jax: 0.10.0
libtpu: 0.0.40
codegen_flags: <defaults>
</compile_context>

<pallas_src>
import functools

import jax
import jax.numpy as jnp
from jax import lax
from jax.experimental import pallas as pl
from jax.experimental.pallas import tpu as pltpu


def _round_up(v, m):
    return -(-v // m) * m


def _prompt_block_kernel(x_ref, w_in_ref, b_in_ref, w1_ref, b1_ref, o_ref,
                         *, hide_pad, hw_valid):
    """Processes one (bt, C, HWp) bf16 block; writes (bt, half, HWp) bf16."""
    bt = x_ref.shape[0]
    hw_pad = x_ref.shape[-1]

    w_in = w_in_ref[...]          # (2*hide_pad, C)   bf16  (MXU operand)
    b_in = b_in_ref[...]          # (2*hide_pad, 1)   f32
    w1 = w1_ref[...]              # (half, hide_pad)  f32
    b1 = b1_ref[...]              # (half, 1)         f32

    def one(i, carry):
        xi = x_ref[i]                                           # (C, HWp) bf16
        # Both 1x1 convs in one MXU matmul over the full channel dim
        # (block-diagonal W_in), bf16 x bf16 -> f32 accumulate.
        h = jnp.dot(w_in, xi, preferred_element_type=jnp.float32) + b_in
        h0 = h[:hide_pad, :]                                    # conv0_0(x0)
        h1 = h[hide_pad:, :]                                    # conv0_1(x1)
        if hw_valid != hw_pad:
            lane = lax.broadcasted_iota(jnp.int32, h0.shape, 1)
            h0 = jnp.where(lane < hw_valid, h0, -1e30)          # exp -> 0 on pad
        # Fovea (smooth=False): softmax over the flattened spatial dim, gate h0.
        e = jnp.exp(h0 - jnp.max(h0, axis=-1, keepdims=True))   # EUP
        inv = pl.reciprocal(jnp.sum(e, axis=-1, keepdims=True), approx=True)
        f = (e * inv) * h0 + h1                                 # (hide_pad, HWp)
        # Final 1x1 conv (hide -> inplanes); tiny f32 matmul (K = hide_pad).
        out_i = jnp.dot(w1, f, preferred_element_type=jnp.float32) + b1
        o_ref[i] = out_i.astype(o_ref.dtype)
        return carry

    if bt <= 8:
        for i in range(bt):       # fully unrolled; iterations are independent
            one(i, 0)
    else:
        lax.fori_loop(0, bt, one, 0)


def _pick_block_batch(B, per_elem_bytes, *, target_bytes=2 << 20,
                      min_block_bytes=512 << 10):
    """Largest divisor of B whose bf16 x-block fits the byte budget; prefer
    >=4 (else >=2) grid steps for DMA overlap / v7x dual TensorCore, but only
    if that keeps the block reasonably large (>= min_block_bytes)."""
    divisors = [d for d in range(1, B + 1) if B % d == 0]
    fits = [d for d in divisors if d * per_elem_bytes <= target_bytes] or [1]
    bt = max(fits)
    for steps in (4, 2):
        if B // bt >= steps:
            break
        cand = [d for d in fits
                if B // d >= steps and d * per_elem_bytes >= min_block_bytes]
        if cand:
            bt = max(cand)
            break
    return bt


def _vmem_capacity_bytes():
    try:
        return int(pltpu.get_tpu_info().vmem_capacity_bytes)
    except Exception:
        return 64 << 20           # conservative fallback (v7x per-TC VMEM)


def prompt_block(x_nchw, params, *, block_batch=None, out_dtype=jnp.bfloat16):
    """x_nchw: [B, C, W, H].  Returns [B, C//2, W, H] in `out_dtype`."""
    B, C, W, H = x_nchw.shape
    assert C % 2 == 0, "Prompt_block splits the channel dim in half"
    half = C // 2
    hide = params["w00"].shape[0]
    assert params["w00"].shape == (hide, half)
    hw = W * H
    hw_pad = _round_up(hw, 128)           # lane-dense stores
    hide_pad = _round_up(hide, 8)         # sublane-aligned split of h

    # --- input: bf16 feed (halves the dominant HBM read), flattened spatial.
    x = x_nchw.reshape(B, C, hw).astype(jnp.bfloat16)
    if hw_pad != hw:
        x = jnp.pad(x, ((0, 0), (0, 0), (0, hw_pad - hw)))

    # --- weights: fold conv0_0 / conv0_1 into one block-diagonal weight so a
    # single full-C matmul replaces two half-C matmuls (fold done in f32,
    # cast to bf16 only at the end for the MXU).
    w_in = jnp.zeros((2 * hide_pad, C), jnp.float32)
    w_in = w_in.at[:hide, :half].set(params["w00"].astype(jnp.float32))
    w_in = w_in.at[hide_pad:hide_pad + hide, half:].set(
        params["w01"].astype(jnp.float32))
    w_in = w_in.astype(jnp.bfloat16)

    b_in = jnp.zeros((2 * hide_pad, 1), jnp.float32)
    b_in = b_in.at[:hide, 0].set(params["b00"].astype(jnp.float32))
    b_in = b_in.at[hide_pad:hide_pad + hide, 0].set(
        params["b01"].astype(jnp.float32))

    # Final conv weight kept f32: its LHS partner (gated f32) already lives in
    # registers, so a bf16 cast would cost VPU work for zero HBM savings.
    w1 = jnp.zeros((half, hide_pad), jnp.float32)
    w1 = w1.at[:, :hide].set(params["w1"].astype(jnp.float32))
    b1 = params["b1"].astype(jnp.float32).reshape(half, 1)

    # --- block sizing from a byte budget (review: ~1-4 MiB of x / grid step).
    per_elem = C * hw_pad * x.dtype.itemsize
    bt = _pick_block_batch(B, per_elem) if block_batch is None else block_batch
    assert B % bt == 0, "block_batch must divide B"
    grid = (B // bt,)

    # --- VMEM budget: double-buffered x/out blocks + weights + f32 temps,
    # capped at ~75% of this generation's physical VMEM (v7x ~48 MiB,
    # v5e/v6e ~96 MiB).
    x_blk = bt * per_elem
    out_blk = bt * half * hw_pad * jnp.dtype(out_dtype).itemsize
    w_bytes = w_in.size * 2 + (b_in.size + w1.size + b1.size) * 4
    temps = (6 * hide_pad + 2 * half) * hw_pad * 4 * min(bt, 8)
    needed = 2 * x_blk + 2 * out_blk + 2 * w_bytes + temps
    vmem_limit = int(min(max(needed + (8 << 20), 32 << 20),
                         int(0.75 * _vmem_capacity_bytes())))

    flops = 2 * B * hw_pad * (2 * hide_pad * C + half * hide_pad)
    bytes_accessed = (x.size * x.dtype.itemsize
                      + B * half * hw_pad * jnp.dtype(out_dtype).itemsize
                      + w_bytes)

    kernel = functools.partial(_prompt_block_kernel,
                               hide_pad=hide_pad, hw_valid=hw)

    def _full(a):
        nd = a.ndim
        return pl.BlockSpec(a.shape, lambda i, _nd=nd: (0,) * _nd)

    out = pl.pallas_call(
        kernel,
        out_shape=jax.ShapeDtypeStruct((B, half, hw_pad), out_dtype),
        grid_spec=pltpu.PrefetchScalarGridSpec(
            num_scalar_prefetch=0,
            grid=grid,
            in_specs=[
                pl.BlockSpec((bt, C, hw_pad), lambda i: (i, 0, 0)),
                _full(w_in), _full(b_in), _full(w1), _full(b1),
            ],
            out_specs=pl.BlockSpec((bt, half, hw_pad), lambda i: (i, 0, 0)),
        ),
        compiler_params=pltpu.CompilerParams(
            dimension_semantics=("parallel",),
            vmem_limit_bytes=vmem_limit),
        cost_estimate=pl.CostEstimate(
            flops=int(flops),
            transcendentals=int(B * hide_pad * hw_pad),
            bytes_accessed=int(bytes_accessed)),
    )(x, w_in, b_in, w1, b1)

    if hw_pad != hw:
        out = out[:, :, :hw]
    return out.reshape(B, half, W, H)


def init_params(key, inplanes, hide_channel):
    """Deterministic Xavier-uniform weights + PyTorch-default-style biases."""
    k = jax.random.split(key, 6)

    def xavier(key, fan_out, fan_in):
        bound = (6.0 / (fan_in + fan_out)) ** 0.5
        return jax.random.uniform(key, (fan_out, fan_in), jnp.float32, -bound, bound)

    def bias(key, n, fan_in):
        bound = 1.0 / (fan_in ** 0.5)
        return jax.random.uniform(key, (n,), jnp.float32, -bound, bound)

    return {
        "w00": xavier(k[0], hide_channel, inplanes),
        "b00": bias(k[1], hide_channel, inplanes),
        "w01": xavier(k[2], hide_channel, inplanes),
        "b01": bias(k[3], hide_channel, inplanes),
        "w1": xavier(k[4], inplanes, hide_channel),
        "b1": bias(k[5], inplanes, hide_channel),
    }


def _reference(x_nchw, params):
    """Pure-JAX f32 reference mirroring the PyTorch forward (smooth=False),
    on the same bf16-quantized input the kernel consumes.  Remaining kernel
    vs. reference differences: bf16 first-stage weights, approx reciprocal in
    the softmax, bf16 output store (~1% combined, covered by the tolerance)."""
    xq = x_nchw.astype(jnp.bfloat16).astype(jnp.float32)
    B, C, W, H = x_nchw.shape
    half = C // 2
    x0 = xq[:, :half].reshape(B, half, W * H)
    x1 = xq[:, half:].reshape(B, half, W * H)
    h0 = jnp.einsum("oc,bcs->bos", params["w00"], x0) + params["b00"][None, :, None]
    h1 = jnp.einsum("oc,bcs->bos", params["w01"], x1) + params["b01"][None, :, None]
    mask = jax.nn.softmax(h0, axis=-1)
    f = mask * h0 + h1
    out = jnp.einsum("oc,bcs->bos", params["w1"], f) + params["b1"][None, :, None]
    return out.reshape(B, half, W, H)


if __name__ == "__main__":
    key = jax.random.PRNGKey(0)
    k_x, k_p = jax.random.split(key)

    # Small shapes consistent with the module: the forward splits C in half,
    # so inplanes=8 -> C=16; hide_channel=4; 16x16 spatial (HW=256, lane-dense).
    B, inplanes, hide_channel, Wd, Hd = 4, 8, 4, 16, 16
    C = 2 * inplanes
    x = jax.random.normal(k_x, (B, C, Wd, Hd), jnp.float32)
    params = init_params(k_p, inplanes, hide_channel)

    out = jax.block_until_ready(prompt_block(x, params))
    assert out.shape == (B, inplanes, Wd, Hd)

    ref = _reference(x, params)
    out_f32 = out.astype(jnp.float32)
    max_err = float(jnp.max(jnp.abs(out_f32 - ref)))
    scale = float(jnp.max(jnp.abs(ref)))
    assert max_err <= 2e-2 + 1e-2 * scale, (
        f"mismatch vs reference: max_err={max_err}, scale={scale}")

    print("KERNEL_OK")
</pallas_src>

<mosaic_0001>
module attributes {stable_mosaic.version = 11 : i64} {
  func.func @_prompt_block_kernel(%arg0: i32, %arg1: memref<4x16x256xbf16, #tpu.memory_space<vmem>>, %arg2: memref<16x16xbf16, #tpu.memory_space<vmem>>, %arg3: memref<16x1xf32, #tpu.memory_space<vmem>>, %arg4: memref<8x8xf32, #tpu.memory_space<vmem>>, %arg5: memref<8x1xf32, #tpu.memory_space<vmem>>, %arg6: memref<4x8x256xbf16, #tpu.memory_space<vmem>>) attributes {dimension_semantics = [#tpu.dimension_semantics<parallel>], iteration_bounds = array<i64: 1>, scalar_prefetch = 0 : i64, scratch_operands = 0 : i64, tpu.core_type = #tpu.core_type<tc>, window_params = [{transform_indices = @transform_0, window_bounds = array<i64: 4, 16, 256>}, {pipeline_mode = #tpu.pipeline_mode<synchronous>, transform_indices = @transform_1, window_bounds = array<i64: 16, 16>}, {pipeline_mode = #tpu.pipeline_mode<synchronous>, transform_indices = @transform_2, window_bounds = array<i64: 16, 1>}, {pipeline_mode = #tpu.pipeline_mode<synchronous>, transform_indices = @transform_3, window_bounds = array<i64: 8, 8>}, {pipeline_mode = #tpu.pipeline_mode<synchronous>, transform_indices = @transform_4, window_bounds = array<i64: 8, 1>}, {transform_indices = @transform_5, window_bounds = array<i64: 4, 8, 256>}]} {
    %c0 = arith.constant 0 : index
    %c0_0 = arith.constant 0 : index
    %0 = vector.load %arg2[%c0, %c0_0] : memref<16x16xbf16, #tpu.memory_space<vmem>>, vector<16x16xbf16>
    %c0_1 = arith.constant 0 : index
    %c0_2 = arith.constant 0 : index
    %1 = vector.load %arg3[%c0_1, %c0_2] : memref<16x1xf32, #tpu.memory_space<vmem>>, vector<16x1xf32>
    %c0_3 = arith.constant 0 : index
    %c0_4 = arith.constant 0 : index
    %2 = vector.load %arg4[%c0_3, %c0_4] : memref<8x8xf32, #tpu.memory_space<vmem>>, vector<8x8xf32>
    %c0_5 = arith.constant 0 : index
    %c0_6 = arith.constant 0 : index
    %3 = vector.load %arg5[%c0_5, %c0_6] : memref<8x1xf32, #tpu.memory_space<vmem>>, vector<8x1xf32>
    %c0_7 = arith.constant 0 : index
    %c0_8 = arith.constant 0 : index
    %c0_9 = arith.constant 0 : index
    %4 = vector.load %arg1[%c0_7, %c0_8, %c0_9] : memref<4x16x256xbf16, #tpu.memory_space<vmem>>, vector<1x16x256xbf16>
    %5 = vector.shape_cast %4 : vector<1x16x256xbf16> to vector<16x256xbf16>
    %cst = arith.constant dense<0.000000e+00> : vector<16x256xf32>
    %6 = tpu.matmul %0, %5, %cst {dimension_numbers = #tpu.dot_dimension_numbers<[1], [0], [0], [1], [0, 0, 1, 1], [], []>} : vector<16x16xbf16>, vector<16x256xbf16>, vector<16x256xf32> -> vector<16x256xf32>
    %7 = vector.broadcast %1 : vector<16x1xf32> to vector<16x256xf32>
    %8 = arith.addf %6, %7 : vector<16x256xf32>
    %9 = vector.extract_strided_slice %8 {offsets = [0, 0], sizes = [8, 256], strides = [1, 1]} : vector<16x256xf32> to vector<8x256xf32>
    %10 = vector.extract_strided_slice %8 {offsets = [8, 0], sizes = [8, 256], strides = [1, 1]} : vector<16x256xf32> to vector<8x256xf32>
    %cst_10 = arith.constant dense<0xFF800000> : vector<8xf32>
    %11 = vector.multi_reduction <maximumf>, %9, %cst_10 [1] : vector<8x256xf32> to vector<8xf32>
    %12 = vector.shape_cast %11 : vector<8xf32> to vector<8x1xf32>
    %13 = vector.broadcast %12 : vector<8x1xf32> to vector<8x256xf32>
    %14 = arith.subf %9, %13 : vector<8x256xf32>
    %15 = math.exp %14 : vector<8x256xf32>
    %cst_11 = arith.constant dense<0.000000e+00> : vector<8xf32>
    %16 = vector.multi_reduction <add>, %15, %cst_11 [1] : vector<8x256xf32> to vector<8xf32>
    %17 = vector.shape_cast %16 : vector<8xf32> to vector<8x1xf32>
    %18 = tpu.reciprocal %17 {approx = true} : vector<8x1xf32> -> vector<8x1xf32>
    %19 = vector.broadcast %18 : vector<8x1xf32> to vector<8x256xf32>
    %20 = arith.mulf %15, %19 : vector<8x256xf32>
    %21 = arith.mulf %20, %9 : vector<8x256xf32>
    %22 = arith.addf %21, %10 : vector<8x256xf32>
    %cst_12 = arith.constant dense<0.000000e+00> : vector<8x256xf32>
    %23 = tpu.matmul %2, %22, %cst_12 {dimension_numbers = #tpu.dot_dimension_numbers<[1], [0], [0], [1], [0, 0, 1, 1], [], []>} : vector<8x8xf32>, vector<8x256xf32>, vector<8x256xf32> -> vector<8x256xf32>
    %24 = vector.broadcast %3 : vector<8x1xf32> to vector<8x256xf32>
    %25 = arith.addf %23, %24 : vector<8x256xf32>
    %26 = arith.truncf %25 : vector<8x256xf32> to vector<8x256xbf16>
    %c0_13 = arith.constant 0 : index
    %c0_14 = arith.constant 0 : index
    %c0_15 = arith.constant 0 : index
    %27 = vector.load %arg6[%c0_13, %c0_14, %c0_15] : memref<4x8x256xbf16, #tpu.memory_space<vmem>>, vector<1x8x256xbf16>
    %28 = vector.shape_cast %27 : vector<1x8x256xbf16> to vector<8x256xbf16>
    %29 = vector.shape_cast %26 : vector<8x256xbf16> to vector<1x8x256xbf16>
    tpu.vector_store %arg6[%c0_13, %c0_14, %c0_15], %29 {strides = array<i32>} : memref<4x8x256xbf16, #tpu.memory_space<vmem>>, vector<1x8x256xbf16>,
    %c1 = arith.constant 1 : index
    %c0_16 = arith.constant 0 : index
    %c0_17 = arith.constant 0 : index
    %30 = vector.load %arg1[%c1, %c0_16, %c0_17] : memref<4x16x256xbf16, #tpu.memory_space<vmem>>, vector<1x16x256xbf16>
    %31 = vector.shape_cast %30 : vector<1x16x256xbf16> to vector<16x256xbf16>
    %cst_18 = arith.constant dense<0.000000e+00> : vector<16x256xf32>
    %32 = tpu.matmul %0, %31, %cst_18 {dimension_numbers = #tpu.dot_dimension_numbers<[1], [0], [0], [1], [0, 0, 1, 1], [], []>} : vector<16x16xbf16>, vector<16x256xbf16>, vector<16x256xf32> -> vector<16x256xf32>
    %33 = vector.broadcast %1 : vector<16x1xf32> to vector<16x256xf32>
    %34 = arith.addf %32, %33 : vector<16x256xf32>
    %35 = vector.extract_strided_slice %34 {offsets = [0, 0], sizes = [8, 256], strides = [1, 1]} : vector<16x256xf32> to vector<8x256xf32>
    %36 = vector.extract_strided_slice %34 {offsets = [8, 0], sizes = [8, 256], strides = [1, 1]} : vector<16x256xf32> to vector<8x256xf32>
    %cst_19 = arith.constant dense<0xFF800000> : vector<8xf32>
    %37 = vector.multi_reduction <maximumf>, %35, %cst_19 [1] : vector<8x256xf32> to vector<8xf32>
    %38 = vector.shape_cast %37 : vector<8xf32> to vector<8x1xf32>
    %39 = vector.broadcast %38 : vector<8x1xf32> to vector<8x256xf32>
    %40 = arith.subf %35, %39 : vector<8x256xf32>
    %41 = math.exp %40 : vector<8x256xf32>
    %cst_20 = arith.constant dense<0.000000e+00> : vector<8xf32>
    %42 = vector.multi_reduction <add>, %41, %cst_20 [1] : vector<8x256xf32> to vector<8xf32>
    %43 = vector.shape_cast %42 : vector<8xf32> to vector<8x1xf32>
    %44 = tpu.reciprocal %43 {approx = true} : vector<8x1xf32> -> vector<8x1xf32>
    %45 = vector.broadcast %44 : vector<8x1xf32> to vector<8x256xf32>
    %46 = arith.mulf %41, %45 : vector<8x256xf32>
    %47 = arith.mulf %46, %35 : vector<8x256xf32>
    %48 = arith.addf %47, %36 : vector<8x256xf32>
    %cst_21 = arith.constant dense<0.000000e+00> : vector<8x256xf32>
    %49 = tpu.matmul %2, %48, %cst_21 {dimension_numbers = #tpu.dot_dimension_numbers<[1], [0], [0], [1], [0, 0, 1, 1], [], []>} : vector<8x8xf32>, vector<8x256xf32>, vector<8x256xf32> -> vector<8x256xf32>
    %50 = vector.broadcast %3 : vector<8x1xf32> to vector<8x256xf32>
    %51 = arith.addf %49, %50 : vector<8x256xf32>
    %52 = arith.truncf %51 : vector<8x256xf32> to vector<8x256xbf16>
    %c1_22 = arith.constant 1 : index
    %c0_23 = arith.constant 0 : index
    %c0_24 = arith.constant 0 : index
    %53 = vector.load %arg6[%c1_22, %c0_23, %c0_24] : memref<4x8x256xbf16, #tpu.memory_space<vmem>>, vector<1x8x256xbf16>
    %54 = vector.shape_cast %53 : vector<1x8x256xbf16> to vector<8x256xbf16>
    %55 = vector.shape_cast %52 : vector<8x256xbf16> to vector<1x8x256xbf16>
    tpu.vector_store %arg6[%c1_22, %c0_23, %c0_24], %55 {strides = array<i32>} : memref<4x8x256xbf16, #tpu.memory_space<vmem>>, vector<1x8x256xbf16>,
    %c2 = arith.constant 2 : index
    %c0_25 = arith.constant 0 : index
    %c0_26 = arith.constant 0 : index
    %56 = vector.load %arg1[%c2, %c0_25, %c0_26] : memref<4x16x256xbf16, #tpu.memory_space<vmem>>, vector<1x16x256xbf16>
    %57 = vector.shape_cast %56 : vector<1x16x256xbf16> to vector<16x256xbf16>
    %cst_27 = arith.constant dense<0.000000e+00> : vector<16x256xf32>
    %58 = tpu.matmul %0, %57, %cst_27 {dimension_numbers = #tpu.dot_dimension_numbers<[1], [0], [0], [1], [0, 0, 1, 1], [], []>} : vector<16x16xbf16>, vector<16x256xbf16>, vector<16x256xf32> -> vector<16x256xf32>
    %59 = vector.broadcast %1 : vector<16x1xf32> to vector<16x256xf32>
    %60 = arith.addf %58, %59 : vector<16x256xf32>
    %61 = vector.extract_strided_slice %60 {offsets = [0, 0], sizes = [8, 256], strides = [1, 1]} : vector<16x256xf32> to vector<8x256xf32>
    %62 = vector.extract_strided_slice %60 {offsets = [8, 0], sizes = [8, 256], strides = [1, 1]} : vector<16x256xf32> to vector<8x256xf32>
    %cst_28 = arith.constant dense<0xFF800000> : vector<8xf32>
    %63 = vector.multi_reduction <maximumf>, %61, %cst_28 [1] : vector<8x256xf32> to vector<8xf32>
    %64 = vector.shape_cast %63 : vector<8xf32> to vector<8x1xf32>
    %65 = vector.broadcast %64 : vector<8x1xf32> to vector<8x256xf32>
    %66 = arith.subf %61, %65 : vector<8x256xf32>
    %67 = math.exp %66 : vector<8x256xf32>
    %cst_29 = arith.constant dense<0.000000e+00> : vector<8xf32>
    %68 = vector.multi_reduction <add>, %67, %cst_29 [1] : vector<8x256xf32> to vector<8xf32>
    %69 = vector.shape_cast %68 : vector<8xf32> to vector<8x1xf32>
    %70 = tpu.reciprocal %69 {approx = true} : vector<8x1xf32> -> vector<8x1xf32>
    %71 = vector.broadcast %70 : vector<8x1xf32> to vector<8x256xf32>
    %72 = arith.mulf %67, %71 : vector<8x256xf32>
    %73 = arith.mulf %72, %61 : vector<8x256xf32>
    %74 = arith.addf %73, %62 : vector<8x256xf32>
    %cst_30 = arith.constant dense<0.000000e+00> : vector<8x256xf32>
    %75 = tpu.matmul %2, %74, %cst_30 {dimension_numbers = #tpu.dot_dimension_numbers<[1], [0], [0], [1], [0, 0, 1, 1], [], []>} : vector<8x8xf32>, vector<8x256xf32>, vector<8x256xf32> -> vector<8x256xf32>
    %76 = vector.broadcast %3 : vector<8x1xf32> to vector<8x256xf32>
    %77 = arith.addf %75, %76 : vector<8x256xf32>
    %78 = arith.truncf %77 : vector<8x256xf32> to vector<8x256xbf16>
    %c2_31 = arith.constant 2 : index
    %c0_32 = arith.constant 0 : index
    %c0_33 = arith.constant 0 : index
    %79 = vector.load %arg6[%c2_31, %c0_32, %c0_33] : memref<4x8x256xbf16, #tpu.memory_space<vmem>>, vector<1x8x256xbf16>
    %80 = vector.shape_cast %79 : vector<1x8x256xbf16> to vector<8x256xbf16>
    %81 = vector.shape_cast %78 : vector<8x256xbf16> to vector<1x8x256xbf16>
    tpu.vector_store %arg6[%c2_31, %c0_32, %c0_33], %81 {strides = array<i32>} : memref<4x8x256xbf16, #tpu.memory_space<vmem>>, vector<1x8x256xbf16>,
    %c3 = arith.constant 3 : index
    %c0_34 = arith.constant 0 : index
    %c0_35 = arith.constant 0 : index
    %82 = vector.load %arg1[%c3, %c0_34, %c0_35] : memref<4x16x256xbf16, #tpu.memory_space<vmem>>, vector<1x16x256xbf16>
    %83 = vector.shape_cast %82 : vector<1x16x256xbf16> to vector<16x256xbf16>
    %cst_36 = arith.constant dense<0.000000e+00> : vector<16x256xf32>
    %84 = tpu.matmul %0, %83, %cst_36 {dimension_numbers = #tpu.dot_dimension_numbers<[1], [0], [0], [1], [0, 0, 1, 1], [], []>} : vector<16x16xbf16>, vector<16x256xbf16>, vector<16x256xf32> -> vector<16x256xf32>
    %85 = vector.broadcast %1 : vector<16x1xf32> to vector<16x256xf32>
    %86 = arith.addf %84, %85 : vector<16x256xf32>
    %87 = vector.extract_strided_slice %86 {offsets = [0, 0], sizes = [8, 256], strides = [1, 1]} : vector<16x256xf32> to vector<8x256xf32>
    %88 = vector.extract_strided_slice %86 {offsets = [8, 0], sizes = [8, 256], strides = [1, 1]} : vector<16x256xf32> to vector<8x256xf32>
    %cst_37 = arith.constant dense<0xFF800000> : vector<8xf32>
    %89 = vector.multi_reduction <maximumf>, %87, %cst_37 [1] : vector<8x256xf32> to vector<8xf32>
    %90 = vector.shape_cast %89 : vector<8xf32> to vector<8x1xf32>
    %91 = vector.broadcast %90 : vector<8x1xf32> to vector<8x256xf32>
    %92 = arith.subf %87, %91 : vector<8x256xf32>
    %93 = math.exp %92 : vector<8x256xf32>
    %cst_38 = arith.constant dense<0.000000e+00> : vector<8xf32>
    %94 = vector.multi_reduction <add>, %93, %cst_38 [1] : vector<8x256xf32> to vector<8xf32>
    %95 = vector.shape_cast %94 : vector<8xf32> to vector<8x1xf32>
    %96 = tpu.reciprocal %95 {approx = true} : vector<8x1xf32> -> vector<8x1xf32>
    %97 = vector.broadcast %96 : vector<8x1xf32> to vector<8x256xf32>
    %98 = arith.mulf %93, %97 : vector<8x256xf32>
    %99 = arith.mulf %98, %87 : vector<8x256xf32>
    %100 = arith.addf %99, %88 : vector<8x256xf32>
    %cst_39 = arith.constant dense<0.000000e+00> : vector<8x256xf32>
    %101 = tpu.matmul %2, %100, %cst_39 {dimension_numbers = #tpu.dot_dimension_numbers<[1], [0], [0], [1], [0, 0, 1, 1], [], []>} : vector<8x8xf32>, vector<8x256xf32>, vector<8x256xf32> -> vector<8x256xf32>
    %102 = vector.broadcast %3 : vector<8x1xf32> to vector<8x256xf32>
    %103 = arith.addf %101, %102 : vector<8x256xf32>
    %104 = arith.truncf %103 : vector<8x256xf32> to vector<8x256xbf16>
    %c3_40 = arith.constant 3 : index
    %c0_41 = arith.constant 0 : index
    %c0_42 = arith.constant 0 : index
    %105 = vector.load %arg6[%c3_40, %c0_41, %c0_42] : memref<4x8x256xbf16, #tpu.memory_space<vmem>>, vector<1x8x256xbf16>
    %106 = vector.shape_cast %105 : vector<1x8x256xbf16> to vector<8x256xbf16>
    %107 = vector.shape_cast %104 : vector<8x256xbf16> to vector<1x8x256xbf16>
    tpu.vector_store %arg6[%c3_40, %c0_41, %c0_42], %107 {strides = array<i32>} : memref<4x8x256xbf16, #tpu.memory_space<vmem>>, vector<1x8x256xbf16>,
    return
  }
  func.func @transform_0(%arg0: i32) -> (i32, i32, i32) {
    %c0_i32 = arith.constant 0 : i32
    %c0_i32_0 = arith.constant 0 : i32
    %c0_i32_1 = arith.constant 0 : i32
    return %arg0, %c0_i32, %c0_i32_0 : i32, i32, i32
  }
  func.func @transform_1(%arg0: i32) -> (i32, i32) {
    %c0_i32 = arith.constant 0 : i32
    %c0_i32_0 = arith.constant 0 : i32
    %c0_i32_1 = arith.constant 0 : i32
    return %c0_i32, %c0_i32_0 : i32, i32
  }
  func.func @transform_2(%arg0: i32) -> (i32, i32) {
    %c0_i32 = arith.constant 0 : i32
    %c0_i32_0 = arith.constant 0 : i32
    %c0_i32_1 = arith.constant 0 : i32
    return %c0_i32, %c0_i32_0 : i32, i32
  }
  func.func @transform_3(%arg0: i32) -> (i32, i32) {
    %c0_i32 = arith.constant 0 : i32
    %c0_i32_0 = arith.constant 0 : i32
    %c0_i32_1 = arith.constant 0 : i32
    return %c0_i32, %c0_i32_0 : i32, i32
  }
  func.func @transform_4(%arg0: i32) -> (i32, i32) {
    %c0_i32 = arith.constant 0 : i32
    %c0_i32_0 = arith.constant 0 : i32
    %c0_i32_1 = arith.constant 0 : i32
    return %c0_i32, %c0_i32_0 : i32, i32
  }
  func.func @transform_5(%arg0: i32) -> (i32, i32, i32) {
    %c0_i32 = arith.constant 0 : i32
    %c0_i32_0 = arith.constant 0 : i32
    %c0_i32_1 = arith.constant 0 : i32
    return %arg0, %c0_i32, %c0_i32_0 : i32, i32, i32
  }
}

</mosaic_0001>

<bundles_post_ra>
// kernel: tpu_custom_call.1
= control target key start
LH: loop header
LB: loop body
LE: loop exit
PB: predicated region body
PF: predicated region fallthrough
CT: control target
= control target key end

     0   :  { %10 = vsyncpa [#allocation3], 0  ;;  %s942_s0 = inlined_call_operand.hbm [shape: bf16[4,16,256], index: 0, kind: input, shape index: {}]   ;;  %s943_s1 = inlined_call_operand.vmem [shape: bf16[16,16], index: 1, kind: input, shape index: {}]   ;;  %s944_s2 = inlined_call_operand.vmem [shape: f32[16,1], index: 2, kind: input, shape index: {}]   ;;  %s945_s3 = inlined_call_operand.vmem [shape: f32[8,8], index: 3, kind: input, shape index: {}]   ;;  %s946_s4 = inlined_call_operand.vmem [shape: f32[8,1], index: 4, kind: input, shape index: {}]   ;;  %s947_s5 = inlined_call_operand.hbm [shape: bf16[4,8,256], index: 5, kind: output, shape index: {}]  }
   0x1   :  { %11 = vsyncpa [#allocation4], 0  ;;  %s823_s18 = smov [#allocation2]  }
   0x2   :  { %s17_s19 = sshll.u32 %s823_s18, 4  ;;  %s18_s19 = int_to_ptr.vmem [resolvable:$true] %s17_s19 }
   0x3   :  { %s787_s20 = scalar_lea.vmem %s18_s19, 1024  ;;  %p792_p1 = scmp.lt.s32.totalorder %s18_s19, %s18_s19 }
   0x4   :  { %p788_p0 = scmp.ne.s32.totalorder %s18_s19, %s787_s20  ;;  %p793_p2 = scmp.lt.s32.totalorder %s787_s20, %s787_s20 }
   0x6   :  { %p794_p3 = por %p793_p2, %p792_p1 }
   0x8   :  { %p795_p4 = pnand %p794_p3, %p788_p0 }
   0xa   :  { %798 = shalt.err (!%p795_p4)
}
   0xb   :  { %s824_s21 = smov 128   ;;  %s825_s22 = smov 8  }
   0xc   :  { %23 = dma.hbm_to_vmem [thread:$0]  %s942_s0, 1024, %s18_s19, [#allocation3], %s824_s21, %s824_s21, %s825_s22  }
   0xd   :  { %819 = dma.done.wait [#allocation3], 1024  }
   0xe   :  { %820 = vsyncadd [#allocation3], 4294966272  ;;  %v826_v0 = vmov 0   ;;  %v742_v1 = vld [vmem:[#allocation2 + $0x4] ss:$8 sps:$4 sm:$0xff]   ;;  %vm69_vm0 = vcmask 130048  }
   0xf   :  { %105 = vmatprep.mubr.bf16.mxu0 %v826_v0  ;;  %740 = vset.pattern.permute.xlu0 %v826_v0  ;;  %v744_v2 = vld [vmem:[#allocation2] ss:$8 sps:$4 sm:$0xff]   ;;  %v827_v20 = vmov 0.0   ;;  %v748_v34 = vld [vmem:[#allocation2 + $0x14] ss:$8 sps:$4 sm:$0xff]   ;;  %vm140_vm1 = vcmask 64512  }
  0x10   :  { %741 = vset.pattern.permute.xlu1 %v826_v0  ;;  %87 = vmatprep.subr.bf16.mxu0 %v742_v1  ;;  %v871_v3 = vld [vmem:[%s943_s1] sm:$0xff]   ;;  %v39_v19 = vld [vmem:[%s944_s2 + $0x8] sm:$0xff]  ;;  %v746_v36 = vld [vmem:[#allocation2 + $0x10] ss:$8 sps:$4 sm:$0xff]  }
  0x11   :  { %v38_v4 = vld [vmem:[%s944_s2] sm:$0xff]  ;;  %88 = vmatpush1.bf16.msra.mxu0 %v744_v2  ;;  %208 = vmatprep.mubr.f32.mxu1 %v827_v20 }
  0x12   :  { %46 = vperm.xlu0 %740, %v38_v4   ;;  %v894_v35 = vld [vmem:[%s945_s3] sm:$0xff] }
  0x13   :  { %v751_v37 = vld [vmem:[#allocation2 + $0x24] ss:$8 sps:$4 sm:$0xff]   ;;  %v749_v38 = vld [vmem:[#allocation2 + $0x20] ss:$8 sps:$4 sm:$0xff]  }
  0x14   :  { %712 = vmatmul.mubr.msk.bf16.vlgmr.msra.gmra.mxu0 %vm69_vm0, %v871_v3 }
  0x15   :  { %363 = vmatprep.mubr.f32.mxu0 %v827_v20 }
  0x8d   :  { %v878_v5 = vpop.permute.xlu0 %46 }
  0xd4   :  { %v107_v6 = vpop.f32.mrf.mxu0 }
  0xd5   :  { %v108_v8 = vadd.f32 %v107_v6, %v878_v5 }
  0xd6   :  { %v109_v7 = vpop.f32.mrf.mxu0 }
  0xd7   :  { %v110_v9 = vadd.f32 %v109_v7, %v878_v5 }
  0xd8   :  { %v111_v22 = vpop.f32.mrf.mxu0 }
  0xd9   :  { %v116_v10 = vmax.f32 %v108_v8, %v110_v9 }
  0xda   :  { %v113_v27 = vpop.f32.mrf.mxu0 }
  0xdb   :  { %117 = vmax.xlane.f32.xlu0 %v116_v10 }
 0x164   :  { %v118_v11 = vpop.xlane.xlu0 %117 }
 0x165   :  { %v119_v12 = vsub.f32 %v108_v8, %v118_v11  ;;  %v120_v13 = vsub.f32 %v110_v9, %v118_v11 }
 0x167   :  { %v121_v14 = vmul.f32 1.442695, %v119_v12  ;;  %v123_v15 = vmul.f32 1.442695, %v120_v13 }
 0x169   :  { %755 = vpow2.f32 %v121_v14 }
 0x16a   :  { %757 = vpow2.f32 %v123_v15 }
 0x176   :  { %v756_v16 = vpop.eup %755 }
 0x177   :  { %v758_v17 = vpop.eup %757 }
 0x178   :  { %v125_v18 = vadd.f32 %v758_v17, %v756_v16 }
 0x17a   :  { %126 = vadd.xlane.f32.xlu1 %v125_v18 }
 0x18b   :  { %51 = vperm.xlu1 %741, %v39_v19  }
 0x203   :  { %v127_v21 = vpop.xlane.xlu1 %126 }
 0x204   :  { %759 = vrcp.f32 %v127_v21 }
 0x207   :  { %v887_v24 = vpop.permute.xlu1 %51 }
 0x208   :  { %v114_v28 = vadd.f32 %v113_v27, %v887_v24  ;;  %v112_v30 = vadd.f32 %v111_v22, %v887_v24 }
 0x211   :  { %v760_v23 = vpop.eup %759 }
 0x212   :  { %v130_v25 = vmul.f32 %v760_v23, %v758_v17  ;;  %v129_v26 = vmul.f32 %v760_v23, %v756_v16 }
 0x214   :  { %v132_v29 = vmul.f32 %v130_v25, %v110_v9  ;;  %v131_v31 = vmul.f32 %v129_v26, %v108_v8 }
 0x216   :  { %v134_v32 = vadd.f32 %v132_v29, %v114_v28  ;;  %v133_v33 = vadd.f32 %v131_v31, %v112_v30 }
 0x218   :  { %174 = vmatprep.subr.mxu1 %v134_v32  ;;  %v754_v32 = vld [vmem:[#allocation2 + $0x34] ss:$8 sps:$4 sm:$0xff]  }
 0x219   :  { %175 = vmatpush1.msra.mxu1 %v133_v33  ;;  %v752_v33 = vld [vmem:[#allocation2 + $0x30] ss:$8 sps:$4 sm:$0xff]  }
 0x21a   :  { %713 = vmatmul.mubr.msk.f32.vlgmr.msra.gmra.mxu1 %vm140_vm1, %v894_v35  ;;  %251 = vmatprep.subr.bf16.mxu1 %v748_v34 }
 0x21b   :  { %252 = vmatpush1.bf16.msra.mxu1 %v746_v36  ;;  %269 = vmatprep.mubr.bf16.mxu1 %v826_v0 }
 0x21c   :  { %407 = vmatprep.subr.bf16.mxu1 %v751_v37 }
 0x21e   :  { %717 = vmatmul.mubr.msk.bf16.vlgmr.msra.gmra.mxu1 %vm69_vm0, %v871_v3 }
 0x21f   :  { %408 = vmatpush1.bf16.msra.mxu1 %v749_v38  ;;  %425 = vmatprep.mubr.bf16.mxu1 %v826_v0 }
 0x226   :  { %722 = vmatmul.mubr.msk.bf16.vlgmr.msra.gmra.mxu1 %vm69_vm0, %v871_v3 }
 0x227   :  { %675 = vmatprep.mubr.f32.mxu1 %v827_v20 }
 0x2da   :  { %v905_v39 = vpop.f32.mrf.mxu1 }
 0x2dc   :  { %v907_v40 = vpop.f32.mrf.mxu1 }
 0x2de   :  { %v271_v41 = vpop.f32.mrf.mxu1 }
 0x2df   :  { %v272_v43 = vadd.f32 %v271_v41, %v878_v5 }
 0x2e0   :  { %v273_v42 = vpop.f32.mrf.mxu1 }
 0x2e1   :  { %v274_v44 = vadd.f32 %v273_v42, %v878_v5 }
 0x2e2   :  { %v275_v45 = vpop.f32.mrf.mxu1 }
 0x2e3   :  { %v280_v46 = vmax.f32 %v272_v43, %v274_v44  ;;  %v276_v13 = vadd.f32 %v275_v45, %v887_v24 }
 0x2e4   :  { %v277_v47 = vpop.f32.mrf.mxu1 }
 0x2e5   :  { %281 = vmax.xlane.f32.xlu1 %v280_v46  ;;  %v278_v14 = vadd.f32 %v277_v47, %v887_v24 }
 0x2e6   :  { %v427_v48 = vpop.f32.mrf.mxu1 }
 0x2e7   :  { %v428_v50 = vadd.f32 %v427_v48, %v878_v5 }
 0x2e8   :  { %v429_v49 = vpop.f32.mrf.mxu1 }
 0x2e9   :  { %v430_v51 = vadd.f32 %v429_v49, %v878_v5 }
 0x2ea   :  { %v431_v17 = vpop.f32.mrf.mxu1 }
 0x2eb   :  { %v436_v52 = vmax.f32 %v428_v50, %v430_v51  ;;  %v432_v26 = vadd.f32 %v431_v17, %v887_v24 }
 0x2ec   :  { %v433_v22 = vpop.f32.mrf.mxu1 }
 0x2ed   :  { %437 = vmax.xlane.f32.xlu0 %v436_v52  ;;  %v434_v27 = vadd.f32 %v433_v22, %v887_v24 }
 0x36e   :  { %v282_v53 = vpop.xlane.xlu1 %281 }
 0x36f   :  { %v283_v54 = vsub.f32 %v272_v43, %v282_v53  ;;  %v284_v55 = vsub.f32 %v274_v44, %v282_v53 }
 0x371   :  { %v285_v56 = vmul.f32 1.442695, %v283_v54  ;;  %v287_v57 = vmul.f32 1.442695, %v284_v55 }
 0x373   :  { %761 = vpow2.f32 %v285_v56 }
 0x374   :  { %763 = vpow2.f32 %v287_v57 }
 0x376   :  { %v438_v58 = vpop.xlane.xlu0 %437 }
 0x377   :  { %v439_v59 = vsub.f32 %v428_v50, %v438_v58  ;;  %v440_v60 = vsub.f32 %v430_v51, %v438_v58 }
 0x379   :  { %v441_v61 = vmul.f32 1.442695, %v439_v59  ;;  %v443_v62 = vmul.f32 1.442695, %v440_v60 }
 0x37b   :  { %765 = vpow2.f32 %v441_v61 }
 0x37c   :  { %767 = vpow2.f32 %v443_v62 }
 0x380   :  { %v762_v63 = vpop.eup %761 }
 0x381   :  { %v764_v1 = vpop.eup %763 }
 0x382   :  { %v289_v2 = vadd.f32 %v764_v1, %v762_v63 }
 0x384   :  { %290 = vadd.xlane.f32.xlu0 %v289_v2 }
 0x388   :  { %v766_v4 = vpop.eup %765 }
 0x389   :  { %v768_v6 = vpop.eup %767 }
 0x38a   :  { %v445_v7 = vadd.f32 %v768_v6, %v766_v4 }
 0x38c   :  { %446 = vadd.xlane.f32.xlu0 %v445_v7 }
 0x40d   :  { %v291_v8 = vpop.xlane.xlu0 %290 }
 0x40e   :  { %769 = vrcp.f32 %v291_v8 }
 0x415   :  { %v447_v9 = vpop.xlane.xlu0 %446 }
 0x416   :  { %771 = vrcp.f32 %v447_v9 }
 0x41b   :  { %v770_v10 = vpop.eup %769 }
 0x41c   :  { %v294_v11 = vmul.f32 %v770_v10, %v764_v1  ;;  %v293_v12 = vmul.f32 %v770_v10, %v762_v63 }
 0x41e   :  { %v296_v15 = vmul.f32 %v294_v11, %v274_v44  ;;  %v295_v16 = vmul.f32 %v293_v12, %v272_v43 }
 0x420   :  { %v298_v18 = vadd.f32 %v296_v15, %v278_v14  ;;  %v297_v19 = vadd.f32 %v295_v16, %v276_v13 }
 0x422   :  { %329 = vmatprep.subr.mxu0 %v298_v18 }
 0x423   :  { %v772_v21 = vpop.eup %771  ;;  %330 = vmatpush1.msra.mxu0 %v297_v19 }
 0x424   :  { %718 = vmatmul.mubr.msk.f32.vlgmr.msra.gmra.mxu0 %vm140_vm1, %v894_v35  ;;  %v450_v23 = vmul.f32 %v772_v21, %v768_v6  ;;  %v449_v25 = vmul.f32 %v772_v21, %v766_v4 }
 0x425   :  { %519 = vmatprep.mubr.f32.mxu0 %v827_v20 }
 0x426   :  { %v452_v28 = vmul.f32 %v450_v23, %v430_v51  ;;  %v451_v29 = vmul.f32 %v449_v25, %v428_v50  ;;  %v41_v51 = vld [vmem:[%s946_s4] sm:$0xff]  ;;  %s828_s4 = smov [#allocation5]  }
 0x427   :  { %s697_s6 = sshll.u32 %s828_s4, 4  ;;  %s698_s6 = int_to_ptr.vmem [resolvable:$true] %s697_s6 }
 0x428   :  { %v454_v30 = vadd.f32 %v452_v28, %v434_v27  ;;  %v453_v31 = vadd.f32 %v451_v29, %v432_v26  ;;  %s799_s7 = scalar_lea.vmem %s698_s6, 512  ;;  %p804_p6 = scmp.lt.s32.totalorder %s698_s6, %s698_s6 }
 0x429   :  { %p800_p5 = scmp.ne.s32.totalorder %s698_s6, %s799_s7  ;;  %p805_p7 = scmp.lt.s32.totalorder %s799_s7, %s799_s7 }
 0x42a   :  { %485 = vmatprep.subr.mxu0 %v454_v30 }
 0x42b   :  { %486 = vmatpush1.msra.mxu0 %v453_v31  ;;  %p806_p8 = por %p805_p7, %p804_p6 }
 0x42c   :  { %723 = vmatmul.mubr.msk.f32.vlgmr.msra.gmra.mxu0 %vm140_vm1, %v894_v35  ;;  %563 = vmatprep.subr.bf16.mxu0 %v754_v32 }
 0x42d   :  { %564 = vmatpush1.bf16.msra.mxu0 %v752_v33  ;;  %581 = vmatprep.mubr.bf16.mxu0 %v826_v0  ;;  %p807_p9 = pnand %p806_p8, %p800_p5 }
 0x430   :  { %727 = vmatmul.mubr.msk.bf16.vlgmr.msra.gmra.mxu0 %vm69_vm0, %v871_v3 }
 0x4e4   :  { %v365_v20 = vpop.f32.mrf.mxu0 }
 0x4e6   :  { %v367_v34 = vpop.f32.mrf.mxu0 }
 0x4ec   :  { %v521_v36 = vpop.f32.mrf.mxu0 }
 0x4ee   :  { %v523_v37 = vpop.f32.mrf.mxu0 }
 0x4f0   :  { %v583_v38 = vpop.f32.mrf.mxu0 }
 0x4f1   :  { %v584_v42 = vadd.f32 %v583_v38, %v878_v5 }
 0x4f2   :  { %v585_v41 = vpop.f32.mrf.mxu0 }
 0x4f3   :  { %v586_v43 = vadd.f32 %v585_v41, %v878_v5 }
 0x4f4   :  { %v587_v57 = vpop.f32.mrf.mxu0 }
 0x4f5   :  { %v592_v44 = vmax.f32 %v584_v42, %v586_v43  ;;  %v588_v6 = vadd.f32 %v587_v57, %v887_v24 }
 0x4f6   :  { %v589_v1 = vpop.f32.mrf.mxu0 }
 0x4f7   :  { %593 = vmax.xlane.f32.xlu0 %v592_v44 }
 0x580   :  { %v594_v45 = vpop.xlane.xlu0 %593 }
 0x581   :  { %v595_v46 = vsub.f32 %v584_v42, %v594_v45  ;;  %v596_v47 = vsub.f32 %v586_v43, %v594_v45 }
 0x583   :  { %v597_v48 = vmul.f32 1.442695, %v595_v46  ;;  %v599_v0 = vmul.f32 1.442695, %v596_v47 }
 0x585   :  { %773 = vpow2.f32 %v597_v48 }
 0x586   :  { %775 = vpow2.f32 %v599_v0 }
 0x592   :  { %v774_v3 = vpop.eup %773 }
 0x593   :  { %v776_v49 = vpop.eup %775 }
 0x594   :  { %v601_v50 = vadd.f32 %v776_v49, %v774_v3 }
 0x596   :  { %602 = vadd.xlane.f32.xlu0 %v601_v50 }
 0x5ac   :  { %137 = vperm.xlu0 %740, %v41_v51  }
 0x61f   :  { %v603_v52 = vpop.xlane.xlu0 %602 }
 0x620   :  { %777 = vrcp.f32 %v603_v52 }
 0x627   :  { %v138_v5 = vpop.permute.xlu0 %137 }
 0x628   :  { %v211_v53 = vadd.f32 %v905_v39, %v138_v5  ;;  %v213_v54 = vadd.f32 %v907_v40, %v138_v5  ;;  %v366_v55 = vadd.f32 %v365_v20, %v138_v5  ;;  %v368_v56 = vadd.f32 %v367_v34, %v138_v5 }
 0x629   :  { %v522_v58 = vadd.f32 %v521_v36, %v138_v5  ;;  %v524_v59 = vadd.f32 %v523_v37, %v138_v5  ;;  %v590_v39 = vadd.f32 %v589_v1, %v887_v24 }
 0x62a   :  { %v730_v60 = vpack.c.bf16 %v213_v54, %v211_v53  ;;  %v731_v61 = vpack.c.bf16 %v368_v56, %v366_v55 }
 0x62b   :  { %v732_v62 = vpack.c.bf16 %v524_v59, %v522_v58 }
 0x62c   :  { %223 = vst [vmem:[#allocation5] sm:$0xff] %v730_v60  ;;  %379 = vst [vmem:[#allocation5 + $0x8] sm:$0xff] %v731_v61 }
 0x62d   :  { %v778_v63 = vpop.eup %777  ;;  %535 = vst [vmem:[#allocation5 + $0x10] sm:$0xff] %v732_v62 }
 0x62e   :  { %v606_v2 = vmul.f32 %v778_v63, %v776_v49  ;;  %v605_v4 = vmul.f32 %v778_v63, %v774_v3 }
 0x630   :  { %v608_v40 = vmul.f32 %v606_v2, %v586_v43  ;;  %v607_v7 = vmul.f32 %v605_v4, %v584_v42 }
 0x632   :  { %v610_v8 = vadd.f32 %v608_v40, %v590_v39  ;;  %v609_v9 = vadd.f32 %v607_v7, %v588_v6 }
 0x634   :  { %641 = vmatprep.subr.mxu1 %v610_v8 }
 0x635   :  { %642 = vmatpush1.msra.mxu1 %v609_v9 }
 0x636   :  { %728 = vmatmul.mubr.msk.f32.vlgmr.msra.gmra.mxu1 %vm140_vm1, %v894_v35 }
 0x6f6   :  { %v677_v10 = vpop.f32.mrf.mxu1 }
 0x6f7   :  { %v678_v12 = vadd.f32 %v677_v10, %v138_v5 }
 0x6f8   :  { %v679_v11 = vpop.f32.mrf.mxu1 }
 0x6f9   :  { %v680_v13 = vadd.f32 %v679_v11, %v138_v5 }
 0x6fb   :  { %v733_v14 = vpack.c.bf16 %v680_v13, %v678_v12 }
 0x6fd   :  { %691 = vst [vmem:[#allocation5 + $0x18] sm:$0xff] %v733_v14 }
 0x6fe   :  { %810 = shalt.err (!%p807_p9)
}
 0x6ff   :  { %703 = dma.vmem_to_hbm [thread:$0]  %s698_s6, 512, %s947_s5, [#allocation4], %s824_s21, %s824_s21, %s825_s22  }
 0x700   :  { %821 = dma.done.wait [#allocation4], 512  }
 0x701   :  { %822 = vsyncadd [#allocation4], 4294966784 }
 0x702   :  { %707 = vsyncpa [#allocation3], 1 }
 0x703   :  { %708 = vsyncpa [#allocation4], 1 }

</bundles_post_ra>
